<compile_context>
chip_gen: v7x
topology: tpu7x:2x2x1
jax: 0.10.0
libtpu: 0.0.40
codegen_flags: <defaults>
</compile_context>

<pallas_src>
import functools
import math

import jax
import jax.numpy as jnp
import numpy as np
from jax.experimental import pallas as pl
from jax.experimental.pallas import tpu as pltpu


def _cdiv(a, b):
    return -(-a // b)


def _round_up(a, b):
    return _cdiv(a, b) * b


# ----------------------------------------------------------------------------
# Pallas kernel: one (batch, L-tile) step of a dilated / strided 1-D conv.
#   x_ref : (1, tl*stride, Cin)       bf16  main input block for this tile
#   xh_ref: (1, 1, halo_p, Cin)       bf16  right-halo rows for this tile
#   w_ref : (K, Cin, Cout_p)          bf16  full weight (stays resident)
#   b_ref : (1, Cout_p)               f32   bias
#   o_ref : (1, tl, Cout_p)           f32   output tile (lane-dense Cout_p)
#   xw_ref: (tl*stride + halo_p, Cin) f32   VMEM scratch window (main + halo)
# ----------------------------------------------------------------------------
def _conv1d_tiled_kernel(x_ref, xh_ref, w_ref, b_ref, o_ref, xw_ref, *,
                         K, dilation, stride, tl, halo_p, neg_slope):
    tls = tl * stride
    # Assemble the contiguous input window in VMEM.  Scratch is f32 so that
    # the (possibly strided / unaligned) sublane slices below stay on the
    # plain 32-bit load path.
    xw_ref[0:tls, :] = x_ref[0].astype(jnp.float32)
    xw_ref[tls:tls + halo_p, :] = xh_ref[0, 0, :, :].astype(jnp.float32)

    cout_p = o_ref.shape[2]
    acc = jnp.zeros((tl, cout_p), jnp.float32)
    for k in range(K):                               # static unroll over taps
        start = k * dilation
        if stride == 1:
            xk = xw_ref[start:start + tl, :]
        else:
            # stride folded into the kernel: only the rows that feed real
            # outputs are loaded / multiplied.
            xk = xw_ref[pl.ds(start, tl, stride=stride), :]
        acc = acc + jnp.dot(xk.astype(w_ref.dtype), w_ref[k],
                            preferred_element_type=jnp.float32)   # MXU, f32 acc
    acc = acc + b_ref[...]                           # (1, Cout_p) broadcast
    if neg_slope is not None:
        acc = jnp.where(acc >= 0, acc, neg_slope * acc)           # LeakyReLU
    o_ref[0, :, :] = acc.astype(o_ref.dtype)


def pallas_conv1d(x, w, b, *, stride=1, dilation=1, pad_left=0, pad_right=0,
                  neg_slope=0.01, tile_l=512, compute_dtype=jnp.bfloat16,
                  vmem_limit_bytes=48 * 1024 * 1024):
    """Zero-padded 1-D convolution, channels-last.

    x: (B, L, Cin) f32.  w: (K, Cin, Cout).  b: (Cout,).
    Returns (B, Lout, Cout) f32 with
      Lout = (L + pad_left + pad_right - dilation*(K-1) - 1)//stride + 1.
    Fused LeakyReLU(neg_slope) unless neg_slope is None.
    """
    B, L, Cin = x.shape
    K, w_cin, Cout = w.shape
    assert w_cin == Cin, (w_cin, Cin)
    Lp = L + pad_left + pad_right
    Lout = (Lp - dilation * (K - 1) - 1) // stride + 1
    assert Lout >= 1, "convolution output would be empty"

    tl = min(_round_up(Lout, 8), _round_up(max(tile_l, 8), 8))   # output tile rows
    num_tiles = _cdiv(Lout, tl)
    tls = tl * stride                                            # input rows / tile
    halo = max(0, (K - 1) * dilation + 1 - stride)
    halo_p = _round_up(max(halo, 1), 8)
    cout_p = _round_up(Cout, 128)                                # lane-dense stores

    # Single combined pad: conv padding + tile/halo alignment (one HBM pass).
    lx = max(num_tiles * tls + halo_p, Lp)
    x_full = jnp.pad(x.astype(compute_dtype),
                     ((0, 0), (pad_left, lx - pad_left - L), (0, 0)))

    # Per-tile right-halo rows, gathered once (tiny vs. re-reading full blocks).
    row_idx = ((jnp.arange(num_tiles)[:, None] + 1) * tls
               + jnp.arange(halo_p)[None, :])                    # (T, halo_p)
    x_halo = jnp.take(x_full, row_idx, axis=1)                   # (B, T, halo_p, Cin)

    w_p = jnp.pad(w, ((0, 0), (0, 0), (0, cout_p - Cout))).astype(compute_dtype)
    b_p = jnp.pad(b, (0, cout_p - Cout)).astype(jnp.float32).reshape(1, cout_p)

    kernel = functools.partial(_conv1d_tiled_kernel, K=K, dilation=dilation,
                               stride=stride, tl=tl, halo_p=halo_p,
                               neg_slope=neg_slope)
    out = pl.pallas_call(
        kernel,
        out_shape=jax.ShapeDtypeStruct((B, num_tiles * tl, cout_p), jnp.float32),
        grid=(B, num_tiles),
        in_specs=[
            pl.BlockSpec((1, tls, Cin), lambda bi, ti: (bi, ti, 0)),
            pl.BlockSpec((1, 1, halo_p, Cin), lambda bi, ti: (bi, ti, 0, 0)),
            pl.BlockSpec((K, Cin, cout_p), lambda bi, ti: (0, 0, 0)),
            pl.BlockSpec((1, cout_p), lambda bi, ti: (0, 0)),
        ],
        out_specs=pl.BlockSpec((1, tl, cout_p), lambda bi, ti: (bi, ti, 0)),
        scratch_shapes=[pltpu.VMEM((tls + halo_p, Cin), jnp.float32)],
        compiler_params=pltpu.CompilerParams(
            dimension_semantics=("parallel", "parallel"),
            vmem_limit_bytes=vmem_limit_bytes),
    )(x_full, x_halo, w_p, b_p)
    # In a fused multi-layer pipeline you would keep the padded channel space;
    # here we slice back to the module's exact output shape.
    return out[:, :Lout, :Cout]


# ----------------------------------------------------------------------------
# ConvolutionBlock forward (mirrors the PyTorch module)
# ----------------------------------------------------------------------------
def init_convolution_block_params(key, n_inputs, n_outputs, kernel_size,
                                  transpose=False):
    kw, kb = jax.random.split(key)
    if transpose:
        # PyTorch ConvTranspose1d weight layout: (Cin, Cout, K)
        bound = 1.0 / math.sqrt(n_outputs * kernel_size)
        w = jax.random.uniform(kw, (n_inputs, n_outputs, kernel_size),
                               jnp.float32, -bound, bound)
    else:
        # Conv1d weight kept as (K, Cin, Cout) (= PyTorch (Cout, Cin, K) transposed)
        bound = 1.0 / math.sqrt(n_inputs * kernel_size)
        w = jax.random.uniform(kw, (kernel_size, n_inputs, n_outputs),
                               jnp.float32, -bound, bound)
    b = jax.random.uniform(kb, (n_outputs,), jnp.float32, -bound, bound)
    return {"w": w, "b": b}


def convolution_block_forward(x_ncw, params, *, kernel_size, stride, causal,
                              dropout=0.0, transpose=False, dilation=1,
                              padding=0, use_activation=True, neg_slope=0.01,
                              tile_l=512):
    """x_ncw: (B, C_in, L) (PyTorch NCW) -> (B, C_out, L_out)."""
    # TODO(synk): train-mode dropout RNG not reproduced (eval-mode identity).
    del dropout
    B, Cin, L = x_ncw.shape
    x = jnp.transpose(x_ncw, (0, 2, 1))                       # channels-last
    ns = neg_slope if use_activation else None
    K = kernel_size

    if not transpose:
        w, b = params["w"], params["b"]                       # (K, Cin, Cout)
        assert w.shape[0] == K and w.shape[1] == Cin
        if padding > 0:
            if causal:
                padl, padr = padding, 0
            elif dilation == 1:
                padl = padr = padding // 2
            else:
                padl = padr = padding
        else:
            padl = padr = 0
        y = pallas_conv1d(x, w, b, stride=stride, dilation=dilation,
                          pad_left=padl, pad_right=padr, neg_slope=ns,
                          tile_l=tile_l)
    else:
        # nn.ConvTranspose1d(n_in, n_out, K, stride=2, dilation) + Crop1dFrontBack.
        # (The module hard-codes stride=2 in the transposed path; mirrored here.)
        wt, b = params["w"], params["b"]                      # (Cin, Cout, K)
        assert wt.shape[0] == Cin and wt.shape[2] == K
        Cout = wt.shape[1]
        d = dilation
        lout_t = (L - 1) * 2 + d * (K - 1) + 1
        if causal:
            crop_front, crop_back = K - 1 - padding, K - 1
        else:
            assert padding % 2 == 0
            crop_front = crop_back = K - 1 - padding // 2

        # Polyphase: even / odd output positions are two independent stride-1
        # convolutions over x (no zero-upsampled tensor, no zero-MACs).
        phases = []
        u0 = (lout_t + 1) // 2
        for p in (0, 1):
            up = (lout_t - p + 1) // 2
            taps = [k for k in range(K) if (k * d - p) % 2 == 0]
            if not taps:                                      # even d -> odd rows = bias
                yp = jnp.broadcast_to(b.astype(jnp.float32)[None, None, :],
                                      (B, up, Cout))
                if ns is not None:
                    yp = jnp.where(yp >= 0, yp, ns * yp)
                phases.append(yp)
                continue
            dil_p = d if d % 2 == 1 else max(d // 2, 1)
            taps_desc = sorted(taps, reverse=True)
            offs = [(p - k * d) // 2 for k in taps_desc]      # increasing by dil_p
            for a, bb in zip(offs, offs[1:]):
                assert bb - a == dil_p
            padl = -offs[0]
            padr = max(0, (up - 1) + offs[-1] - (L - 1))
            w_phase = jnp.stack([wt[:, :, k] for k in taps_desc], axis=0)
            yp = pallas_conv1d(x, w_phase, b, stride=1, dilation=dil_p,
                               pad_left=padl, pad_right=padr, neg_slope=ns,
                               tile_l=tile_l)
            phases.append(yp[:, :up, :])
        y_even, y_odd = phases
        if y_odd.shape[1] < u0:
            y_odd = jnp.pad(y_odd, ((0, 0), (0, u0 - y_odd.shape[1]), (0, 0)))
        y = jnp.stack([y_even, y_odd], axis=2).reshape(B, 2 * u0, y_even.shape[2])
        y = y[:, :lout_t, :]
        if crop_back > 0:
            y = y[:, crop_front:lout_t - crop_back, :]
        else:
            y = y[:, crop_front:, :]
    return jnp.transpose(y, (0, 2, 1))


# ----------------------------------------------------------------------------
# Pure-JAX reference (same bf16 input/weight rounding as the kernel)
# ----------------------------------------------------------------------------
def ref_convolution_block(x_ncw, params, *, kernel_size, stride, causal,
                          transpose=False, dilation=1, padding=0,
                          use_activation=True, neg_slope=0.01):
    def bf16(a):
        return a.astype(jnp.bfloat16).astype(jnp.float32)

    x = bf16(jnp.transpose(x_ncw, (0, 2, 1)))
    K = kernel_size
    b = params["b"].astype(jnp.float32)
    if not transpose:
        w = bf16(params["w"])
        if padding > 0:
            if causal:
                pads = (padding, 0)
            elif dilation == 1:
                pads = (padding // 2, padding // 2)
            else:
                pads = (padding, padding)
        else:
            pads = (0, 0)
        y = jax.lax.conv_general_dilated(
            x, w, window_strides=(stride,), padding=[pads],
            rhs_dilation=(dilation,), dimension_numbers=("NWC", "WIO", "NWC"),
            precision=jax.lax.Precision.HIGHEST) + b
    else:
        wt = bf16(params["w"])
        B, L, Cin = x.shape
        up = jnp.zeros((B, (L - 1) * 2 + 1, Cin), x.dtype).at[:, ::2, :].set(x)
        w_eq = jnp.transpose(wt[:, :, ::-1], (2, 0, 1))        # (K, Cin, Cout)
        P = dilation * (K - 1)
        y = jax.lax.conv_general_dilated(
            up, w_eq, window_strides=(1,), padding=[(P, P)],
            rhs_dilation=(dilation,), dimension_numbers=("NWC", "WIO", "NWC"),
            precision=jax.lax.Precision.HIGHEST) + b
        if causal:
            cf, cb = K - 1 - padding, K - 1
        else:
            cf = cb = K - 1 - padding // 2
        y = y[:, cf:y.shape[1] - cb, :] if cb > 0 else y[:, cf:, :]
    if use_activation:
        y = jnp.where(y >= 0, y, neg_slope * y)
    return jnp.transpose(y, (0, 2, 1))


# ----------------------------------------------------------------------------
if __name__ == "__main__":
    root = jax.random.PRNGKey(0)
    cases = [
        dict(name="conv_s1_d1", B=2, Cin=32, Cout=128, L=300, kernel_size=7,
             stride=1, causal=False, transpose=False, dilation=1, padding=6,
             tile_l=128),
        dict(name="conv_causal_s2", B=2, Cin=64, Cout=96, L=257, kernel_size=7,
             stride=2, causal=True, transpose=False, dilation=1, padding=6,
             tile_l=64),
        dict(name="conv_dilated", B=2, Cin=48, Cout=64, L=200, kernel_size=7,
             stride=1, causal=False, transpose=False, dilation=4, padding=24,
             tile_l=64),
        dict(name="convT_d1", B=2, Cin=64, Cout=72, L=100, kernel_size=7,
             stride=1, causal=False, transpose=True, dilation=1, padding=6,
             tile_l=64),
        dict(name="convT_causal_d2", B=2, Cin=32, Cout=32, L=60, kernel_size=7,
             stride=1, causal=True, transpose=True, dilation=2, padding=2,
             tile_l=64),
    ]
    keys = jax.random.split(root, len(cases))
    for cfg, k in zip(cases, keys):
        name = cfg["name"]
        kx, kp = jax.random.split(k)
        x = jax.random.normal(kx, (cfg["B"], cfg["Cin"], cfg["L"]), jnp.float32)
        params = init_convolution_block_params(
            kp, cfg["Cin"], cfg["Cout"], cfg["kernel_size"],
            transpose=cfg["transpose"])
        out = convolution_block_forward(
            x, params, kernel_size=cfg["kernel_size"], stride=cfg["stride"],
            causal=cfg["causal"], transpose=cfg["transpose"],
            dilation=cfg["dilation"], padding=cfg["padding"], dropout=0.0,
            tile_l=cfg["tile_l"])
        out = jax.block_until_ready(out)
        ref = ref_convolution_block(
            x, params, kernel_size=cfg["kernel_size"], stride=cfg["stride"],
            causal=cfg["causal"], transpose=cfg["transpose"],
            dilation=cfg["dilation"], padding=cfg["padding"])
        ref = jax.block_until_ready(ref)
        assert out.shape == ref.shape, (name, out.shape, ref.shape)
        assert out.dtype == jnp.float32, name
        assert bool(jnp.all(jnp.isfinite(out))), name
        np.testing.assert_allclose(np.asarray(out), np.asarray(ref),
                                   rtol=5e-3, atol=5e-3, err_msg=name)
    print("KERNEL_OK")
</pallas_src>

<mosaic_0001>
module attributes {stable_mosaic.version = 11 : i64} {
  func.func @_conv1d_tiled_kernel(%arg0: i32, %arg1: i32, %arg2: memref<1x128x32xbf16, #tpu.memory_space<vmem>>, %arg3: memref<1x1x8x32xbf16, #tpu.memory_space<vmem>>, %arg4: memref<7x32x128xbf16, #tpu.memory_space<vmem>>, %arg5: memref<1x128xf32, #tpu.memory_space<vmem>>, %arg6: memref<1x128x128xf32, #tpu.memory_space<vmem>>, %arg7: memref<136x32xf32, #tpu.memory_space<vmem>>) attributes {dimension_semantics = [#tpu.dimension_semantics<parallel>, #tpu.dimension_semantics<parallel>], iteration_bounds = array<i64: 2, 3>, scalar_prefetch = 0 : i64, scratch_operands = 1 : i64, tpu.core_type = #tpu.core_type<tc>, window_params = [{transform_indices = @transform_0, window_bounds = array<i64: 1, 128, 32>}, {transform_indices = @transform_1, window_bounds = array<i64: 1, 1, 8, 32>}, {pipeline_mode = #tpu.pipeline_mode<synchronous>, transform_indices = @transform_2, window_bounds = array<i64: 7, 32, 128>}, {pipeline_mode = #tpu.pipeline_mode<synchronous>, transform_indices = @transform_3, window_bounds = array<i64: 1, 128>}, {transform_indices = @transform_4, window_bounds = array<i64: 1, 128, 128>}]} {
    %c0 = arith.constant 0 : index
    %c0_0 = arith.constant 0 : index
    %c0_1 = arith.constant 0 : index
    %0 = vector.load %arg2[%c0, %c0_0, %c0_1] : memref<1x128x32xbf16, #tpu.memory_space<vmem>>, vector<1x128x32xbf16>
    %1 = vector.shape_cast %0 : vector<1x128x32xbf16> to vector<128x32xbf16>
    %2 = arith.extf %1 : vector<128x32xbf16> to vector<128x32xf32>
    %c0_2 = arith.constant 0 : index
    %c0_3 = arith.constant 0 : index
    %3 = vector.load %arg7[%c0_2, %c0_3] : memref<136x32xf32, #tpu.memory_space<vmem>>, vector<128x32xf32>
    tpu.vector_store %arg7[%c0_2, %c0_3], %2 {strides = array<i32>} : memref<136x32xf32, #tpu.memory_space<vmem>>, vector<128x32xf32>,
    %c0_4 = arith.constant 0 : index
    %c0_5 = arith.constant 0 : index
    %c0_6 = arith.constant 0 : index
    %c0_7 = arith.constant 0 : index
    %4 = vector.load %arg3[%c0_4, %c0_5, %c0_6, %c0_7] : memref<1x1x8x32xbf16, #tpu.memory_space<vmem>>, vector<1x1x8x32xbf16>
    %5 = vector.shape_cast %4 : vector<1x1x8x32xbf16> to vector<8x32xbf16>
    %6 = arith.extf %5 : vector<8x32xbf16> to vector<8x32xf32>
    %c128 = arith.constant 128 : index
    %c0_8 = arith.constant 0 : index
    %7 = vector.load %arg7[%c128, %c0_8] : memref<136x32xf32, #tpu.memory_space<vmem>>, vector<8x32xf32>
    tpu.vector_store %arg7[%c128, %c0_8], %6 {strides = array<i32>} : memref<136x32xf32, #tpu.memory_space<vmem>>, vector<8x32xf32>,
    %cst = arith.constant 0.000000e+00 : f32
    %8 = vector.broadcast %cst : f32 to vector<128x128xf32>
    %c0_9 = arith.constant 0 : index
    %c0_10 = arith.constant 0 : index
    %9 = vector.load %arg7[%c0_9, %c0_10] : memref<136x32xf32, #tpu.memory_space<vmem>>, vector<128x32xf32>
    %10 = arith.truncf %9 : vector<128x32xf32> to vector<128x32xbf16>
    %c0_11 = arith.constant 0 : index
    %c0_12 = arith.constant 0 : index
    %c0_13 = arith.constant 0 : index
    %11 = vector.load %arg4[%c0_11, %c0_12, %c0_13] : memref<7x32x128xbf16, #tpu.memory_space<vmem>>, vector<1x32x128xbf16>
    %12 = vector.shape_cast %11 : vector<1x32x128xbf16> to vector<32x128xbf16>
    %cst_14 = arith.constant dense<0.000000e+00> : vector<128x128xf32>
    %13 = tpu.matmul %10, %12, %cst_14 {dimension_numbers = #tpu.dot_dimension_numbers<[1], [0], [0], [1], [0, 0, 1, 1], [], []>} : vector<128x32xbf16>, vector<32x128xbf16>, vector<128x128xf32> -> vector<128x128xf32>
    %14 = arith.addf %8, %13 : vector<128x128xf32>
    %c1 = arith.constant 1 : index
    %c0_15 = arith.constant 0 : index
    %15 = vector.load %arg7[%c1, %c0_15] : memref<136x32xf32, #tpu.memory_space<vmem>>, vector<128x32xf32>
    %16 = arith.truncf %15 : vector<128x32xf32> to vector<128x32xbf16>
    %c1_16 = arith.constant 1 : index
    %c0_17 = arith.constant 0 : index
    %c0_18 = arith.constant 0 : index
    %17 = vector.load %arg4[%c1_16, %c0_17, %c0_18] : memref<7x32x128xbf16, #tpu.memory_space<vmem>>, vector<1x32x128xbf16>
    %18 = vector.shape_cast %17 : vector<1x32x128xbf16> to vector<32x128xbf16>
    %cst_19 = arith.constant dense<0.000000e+00> : vector<128x128xf32>
    %19 = tpu.matmul %16, %18, %cst_19 {dimension_numbers = #tpu.dot_dimension_numbers<[1], [0], [0], [1], [0, 0, 1, 1], [], []>} : vector<128x32xbf16>, vector<32x128xbf16>, vector<128x128xf32> -> vector<128x128xf32>
    %20 = arith.addf %14, %19 : vector<128x128xf32>
    %c2 = arith.constant 2 : index
    %c0_20 = arith.constant 0 : index
    %21 = vector.load %arg7[%c2, %c0_20] : memref<136x32xf32, #tpu.memory_space<vmem>>, vector<128x32xf32>
    %22 = arith.truncf %21 : vector<128x32xf32> to vector<128x32xbf16>
    %c2_21 = arith.constant 2 : index
    %c0_22 = arith.constant 0 : index
    %c0_23 = arith.constant 0 : index
    %23 = vector.load %arg4[%c2_21, %c0_22, %c0_23] : memref<7x32x128xbf16, #tpu.memory_space<vmem>>, vector<1x32x128xbf16>
    %24 = vector.shape_cast %23 : vector<1x32x128xbf16> to vector<32x128xbf16>
    %cst_24 = arith.constant dense<0.000000e+00> : vector<128x128xf32>
    %25 = tpu.matmul %22, %24, %cst_24 {dimension_numbers = #tpu.dot_dimension_numbers<[1], [0], [0], [1], [0, 0, 1, 1], [], []>} : vector<128x32xbf16>, vector<32x128xbf16>, vector<128x128xf32> -> vector<128x128xf32>
    %26 = arith.addf %20, %25 : vector<128x128xf32>
    %c3 = arith.constant 3 : index
    %c0_25 = arith.constant 0 : index
    %27 = vector.load %arg7[%c3, %c0_25] : memref<136x32xf32, #tpu.memory_space<vmem>>, vector<128x32xf32>
    %28 = arith.truncf %27 : vector<128x32xf32> to vector<128x32xbf16>
    %c3_26 = arith.constant 3 : index
    %c0_27 = arith.constant 0 : index
    %c0_28 = arith.constant 0 : index
    %29 = vector.load %arg4[%c3_26, %c0_27, %c0_28] : memref<7x32x128xbf16, #tpu.memory_space<vmem>>, vector<1x32x128xbf16>
    %30 = vector.shape_cast %29 : vector<1x32x128xbf16> to vector<32x128xbf16>
    %cst_29 = arith.constant dense<0.000000e+00> : vector<128x128xf32>
    %31 = tpu.matmul %28, %30, %cst_29 {dimension_numbers = #tpu.dot_dimension_numbers<[1], [0], [0], [1], [0, 0, 1, 1], [], []>} : vector<128x32xbf16>, vector<32x128xbf16>, vector<128x128xf32> -> vector<128x128xf32>
    %32 = arith.addf %26, %31 : vector<128x128xf32>
    %c4 = arith.constant 4 : index
    %c0_30 = arith.constant 0 : index
    %33 = vector.load %arg7[%c4, %c0_30] : memref<136x32xf32, #tpu.memory_space<vmem>>, vector<128x32xf32>
    %34 = arith.truncf %33 : vector<128x32xf32> to vector<128x32xbf16>
    %c4_31 = arith.constant 4 : index
    %c0_32 = arith.constant 0 : index
    %c0_33 = arith.constant 0 : index
    %35 = vector.load %arg4[%c4_31, %c0_32, %c0_33] : memref<7x32x128xbf16, #tpu.memory_space<vmem>>, vector<1x32x128xbf16>
    %36 = vector.shape_cast %35 : vector<1x32x128xbf16> to vector<32x128xbf16>
    %cst_34 = arith.constant dense<0.000000e+00> : vector<128x128xf32>
    %37 = tpu.matmul %34, %36, %cst_34 {dimension_numbers = #tpu.dot_dimension_numbers<[1], [0], [0], [1], [0, 0, 1, 1], [], []>} : vector<128x32xbf16>, vector<32x128xbf16>, vector<128x128xf32> -> vector<128x128xf32>
    %38 = arith.addf %32, %37 : vector<128x128xf32>
    %c5 = arith.constant 5 : index
    %c0_35 = arith.constant 0 : index
    %39 = vector.load %arg7[%c5, %c0_35] : memref<136x32xf32, #tpu.memory_space<vmem>>, vector<128x32xf32>
    %40 = arith.truncf %39 : vector<128x32xf32> to vector<128x32xbf16>
    %c5_36 = arith.constant 5 : index
    %c0_37 = arith.constant 0 : index
    %c0_38 = arith.constant 0 : index
    %41 = vector.load %arg4[%c5_36, %c0_37, %c0_38] : memref<7x32x128xbf16, #tpu.memory_space<vmem>>, vector<1x32x128xbf16>
    %42 = vector.shape_cast %41 : vector<1x32x128xbf16> to vector<32x128xbf16>
    %cst_39 = arith.constant dense<0.000000e+00> : vector<128x128xf32>
    %43 = tpu.matmul %40, %42, %cst_39 {dimension_numbers = #tpu.dot_dimension_numbers<[1], [0], [0], [1], [0, 0, 1, 1], [], []>} : vector<128x32xbf16>, vector<32x128xbf16>, vector<128x128xf32> -> vector<128x128xf32>
    %44 = arith.addf %38, %43 : vector<128x128xf32>
    %c6 = arith.constant 6 : index
    %c0_40 = arith.constant 0 : index
    %45 = vector.load %arg7[%c6, %c0_40] : memref<136x32xf32, #tpu.memory_space<vmem>>, vector<128x32xf32>
    %46 = arith.truncf %45 : vector<128x32xf32> to vector<128x32xbf16>
    %c6_41 = arith.constant 6 : index
    %c0_42 = arith.constant 0 : index
    %c0_43 = arith.constant 0 : index
    %47 = vector.load %arg4[%c6_41, %c0_42, %c0_43] : memref<7x32x128xbf16, #tpu.memory_space<vmem>>, vector<1x32x128xbf16>
    %48 = vector.shape_cast %47 : vector<1x32x128xbf16> to vector<32x128xbf16>
    %cst_44 = arith.constant dense<0.000000e+00> : vector<128x128xf32>
    %49 = tpu.matmul %46, %48, %cst_44 {dimension_numbers = #tpu.dot_dimension_numbers<[1], [0], [0], [1], [0, 0, 1, 1], [], []>} : vector<128x32xbf16>, vector<32x128xbf16>, vector<128x128xf32> -> vector<128x128xf32>
    %50 = arith.addf %44, %49 : vector<128x128xf32>
    %c0_45 = arith.constant 0 : index
    %c0_46 = arith.constant 0 : index
    %51 = vector.load %arg5[%c0_45, %c0_46] : memref<1x128xf32, #tpu.memory_space<vmem>>, vector<1x128xf32>
    %52 = vector.broadcast %51 : vector<1x128xf32> to vector<128x128xf32>
    %53 = arith.addf %50, %52 : vector<128x128xf32>
    %cst_47 = arith.constant 0.000000e+00 : f32
    %54 = vector.broadcast %cst_47 : f32 to vector<128x128xf32>
    %55 = arith.cmpf oge, %53, %54 : vector<128x128xf32>
    %cst_48 = arith.constant 0.00999999977 : f32
    %56 = vector.broadcast %cst_48 : f32 to vector<128x128xf32>
    %57 = arith.mulf %56, %53 : vector<128x128xf32>
    %58 = arith.select %55, %53, %57 : vector<128x128xi1>, vector<128x128xf32>
    %c0_49 = arith.constant 0 : index
    %c0_50 = arith.constant 0 : index
    %c0_51 = arith.constant 0 : index
    %59 = vector.load %arg6[%c0_49, %c0_50, %c0_51] : memref<1x128x128xf32, #tpu.memory_space<vmem>>, vector<1x128x128xf32>
    %60 = vector.shape_cast %59 : vector<1x128x128xf32> to vector<128x128xf32>
    %61 = vector.shape_cast %58 : vector<128x128xf32> to vector<1x128x128xf32>
    tpu.vector_store %arg6[%c0_49, %c0_50, %c0_51], %61 {strides = array<i32>} : memref<1x128x128xf32, #tpu.memory_space<vmem>>, vector<1x128x128xf32>,
    return
  }
  func.func @transform_0(%arg0: i32, %arg1: i32) -> (i32, i32, i32) {
    %c0_i32 = arith.constant 0 : i32
    %c0_i32_0 = arith.constant 0 : i32
    return %arg0, %arg1, %c0_i32 : i32, i32, i32
  }
  func.func @transform_1(%arg0: i32, %arg1: i32) -> (i32, i32, i32, i32) {
    %c0_i32 = arith.constant 0 : i32
    %c0_i32_0 = arith.constant 0 : i32
    %c0_i32_1 = arith.constant 0 : i32
    return %arg0, %arg1, %c0_i32, %c0_i32_0 : i32, i32, i32, i32
  }
  func.func @transform_2(%arg0: i32, %arg1: i32) -> (i32, i32, i32) {
    %c0_i32 = arith.constant 0 : i32
    %c0_i32_0 = arith.constant 0 : i32
    %c0_i32_1 = arith.constant 0 : i32
    %c0_i32_2 = arith.constant 0 : i32
    return %c0_i32, %c0_i32_0, %c0_i32_1 : i32, i32, i32
  }
  func.func @transform_3(%arg0: i32, %arg1: i32) -> (i32, i32) {
    %c0_i32 = arith.constant 0 : i32
    %c0_i32_0 = arith.constant 0 : i32
    %c0_i32_1 = arith.constant 0 : i32
    return %c0_i32, %c0_i32_0 : i32, i32
  }
  func.func @transform_4(%arg0: i32, %arg1: i32) -> (i32, i32, i32) {
    %c0_i32 = arith.constant 0 : i32
    %c0_i32_0 = arith.constant 0 : i32
    return %arg0, %arg1, %c0_i32 : i32, i32, i32
  }
}

</mosaic_0001>

<bundles_post_ra>
// kernel: tpu_custom_call.1
= control target key start
LH: loop header
LB: loop body
LE: loop exit
PB: predicated region body
PF: predicated region fallthrough
CT: control target
= control target key end

     0   :  { %9 = vsyncpa [#allocation4], 0  ;;  %s2760_s0 = inlined_call_operand.vmem [shape: bf16[2,392,32], index: 0, kind: input, shape index: {}]   ;;  %s2761_s1 = inlined_call_operand.vmem [shape: bf16[2,3,8,32], index: 1, kind: input, shape index: {}]   ;;  %s2762_s2 = inlined_call_operand.vmem [shape: bf16[7,32,128], index: 2, kind: input, shape index: {}]   ;;  %s2763_s3 = inlined_call_operand.vmem [shape: f32[1,128], index: 3, kind: input, shape index: {}]   ;;  %s2764_s4 = inlined_call_operand.hbm [shape: f32[2,384,128], index: 4, kind: output, shape index: {}]  }
   0x1   :  { %11 = vsyncpa [#allocation4 + $0x1], 0  ;;  %s2419_s15 = smov 0   ;;  %s2421_s16 = smov 0  }
   0x2   :  { %s2423_s17 = smov 0   ;;  %s2425_s18 = smov 0  }
   0x3   :  { %s2427_s19 = smov 0   ;;  %s2429_s20 = smov 0  }
   0x4   :  { %s2431_s21 = smov 0   ;;  %s2433_s22 = smov 0  }
   0x5 LB: > { %s1747_s23 = sadd.s32 4294967295, %s2389_s22   ;;  %s1748_s24 = sadd.s32 4294967294, %s2389_s22   ;;  %s2389_s22 = sphi %s2433_s22, %s17_s22   ;;  %s2385_s21 = sphi %s2431_s21, %s2773_s21   ;;  %s2381_s20 = sphi %s2429_s20, %s2772_s20   ;;  %s2377_s19 = sphi %s2427_s19, %s2771_s19   ;;  %s2373_s18 = sphi %s2425_s18, %s2770_s18   ;;  %s2369_s17 = sphi %s2423_s17, %s2769_s17   ;;  %s2365_s16 = sphi %s2421_s16, %s2768_s16   ;;  %s2361_s15 = sphi %s2419_s15, %s2767_s15  }
   0x6   : > { %s26_s25 = sadd.s32 1, %s2381_s20  ;;  %s29_s26 = sadd.s32 1, %s2385_s21 }
   0x7   : > { %p27_p0 = scmp.ge.s32.totalorder %s26_s25, 3  ;;  %p146_p1 = scmp.ne.s32.totalorder %s2369_s17, %s2365_s16 }
   0x8   : > { %p147_p2 = scmp.eq.s32.totalorder %s1747_s23, 5  ;;  %p152_p5 = scmp.ne.s32.totalorder %s2365_s16, %s2361_s15 }
   0x9   : > { %s2775_s25 = smov (%p27_p0, %s26_s25), 0  ;;  %s2777_s26 = smov (!%p27_p0, %s29_s26), %s2385_s21 }
   0xa   : > { %s132_s27 = ssub.s32 %s2381_s20, %s2775_s25  ;;  %p2470_p3 = por %p147_p2, %p146_p1 }
   0xb   : > { %p31_p4 = scmp.ge.s32.totalorder %s2777_s26, 2  ;;  %p153_p6 = scmp.eq.s32.totalorder %s1748_s24, 5 }
   0xc   : > { %p1751_p7 = scmp.ge.s32.totalorder %s2389_s22, 1  ;;  %p209_p9 = scmp.lt.s32.totalorder %s2389_s22, 7 }
   0xd   : > { %s2779_s26 = smov (%p31_p4, %s2777_s26), 0  ;;  %p2479_p8 = por %p153_p6, %p152_p5 }
   0xe   : > { %s131_s30 = ssub.s32 %s2385_s21, %s2779_s26  ;;  %s136_s5 = sadd.s32 1, %s2369_s17 }
   0xf   : > { %s133_s6 = sor.u32 %s132_s27, %s131_s30  ;;  %p210_p10 = pnand %p1751_p7, %p209_p9 }
  0x10   : > { %p134_p11 = scmp.eq.s32.totalorder %s133_s6, 0  ;;  %v2281_v0 = vld [vmem:[%s2762_s2 + $0x10] sm:$0xff] (!%p210_p10)   ;;  %s2494_s10 = sshll.u32 (!%p210_p10), %s2373_s18, 4  ;;  %v2283_v2 = vld [vmem:[%s2762_s2 + $0x18] sm:$0xff] (!%p210_p10)   ;;  %v2522_v4 = vld [vmem:[%s2762_s2] sm:$0xff] (!%p210_p10)   ;;  %vm311_vm0 = vcmask (!%p210_p10), 261120  }
  0x11   : > { %213 = sbr.rel (%p210_p10) target bundleno = 388 (0x184), region = 36  ;;  %v2499_v1 = vld [vmem:[%s2762_s2 + $0x30] sm:$0xff] (!%p210_p10)   ;;  %p256_p12 = scmp.lt.s32.totalorder (!%p210_p10), %s2377_s19, 1  ;;  %1965 = vmatprep.subr.bf16.mxu1 (!%p210_p10), %v2281_v0  ;;  %v2510_v3 = vld [vmem:[%s2762_s2 + $0x38] sm:$0xff] (!%p210_p10)   ;;  %v2527_v5 = vld [vmem:[%s2762_s2 + $0x40] sm:$0xff] (!%p210_p10)  }
  0x12   : > { %s2488_s7 = scalar_select %p134_p11, %s2369_s17, %s136_s5  }
  0x13   : > { %p258_p13 = scmp.lt.s32.totalorder (!%p210_p10), %s2494_s10, 48  ;;  %2025 = vmatprep.subr.bf16.mxu0 (!%p210_p10), %v2499_v1  ;;  %1966 = vmatpush3.bf16.msra.mxu1 (!%p210_p10), %v2281_v0  ;;  %p271_p0 = scmp.lt.s32.totalorder (!%p210_p10), %s2373_s18, 2  ;;  %v2287_v39 = vld [vmem:[%s2762_s2 + $0x48] sm:$0xff] (!%p210_p10)   ;;  %v2572_v52 = vld [vmem:[%s2762_s2 + $0x20] sm:$0xff] (!%p210_p10)   ;;  %v2289_v61 = vld [vmem:[%s2762_s2 + $0x50] sm:$0xff] (!%p210_p10)  }
  0x14   : > { %2026 = vmatpush3.bf16.msra.mxu0 (!%p210_p10), %v2499_v1  ;;  %1967 = vmatprep.subr.bf16.mxu1 (!%p210_p10), %v2283_v2  ;;  %v2288_v51 = vld [vmem:[%s2762_s2 + $0x8] sm:$0xff] (!%p210_p10)  }
  0x15   : > { %2027 = vmatprep.subr.bf16.mxu0 (!%p210_p10), %v2510_v3 }
  0x17   : > { %1968 = vmatpush3.bf16.msra.mxu1 (!%p210_p10), %v2283_v2 }
  0x18   : > { %s2513_s27 = scalar_select %p256_p12, %s2377_s19, 1  ;;  %2028 = vmatpush3.bf16.msra.mxu0 %v2510_v3  ;;  %1985 = vmatprep.subr.bf16.mxu1 %v2522_v4 }
  0x19   : > { %s259_s30 = scalar_select %p258_p13, %s2494_s10, 48  ;;  %2045 = vmatprep.subr.bf16.mxu0 %v2527_v5 }
  0x1a   : > { %s2205_s5 = smul.u32 49, %s2513_s27  ;;  %s2781_s18 = smov (!%p271_p0, %s2373_s18), 2 }
  0x1b   : > { %s2206_s6 = smul.u32 3, %s2513_s27 }
  0x1c   : > { %s261_s12 = sadd.s32 %s2205_s5, %s259_s30 }
  0x1d   : > { %s1754_s13 = sshll.u32 %s261_s12, 2  ;;  %s274_s27 = sadd.s32 %s2206_s6, %s2781_s18 }
  0x1e   : > { %s263_s24 = scalar_lea.vmem %s2760_s0, %s1754_s13  ;;  %s1755_s30 = sshll.u32 %s274_s27, 2 }
  0x1f   : > { %v1857_v6 = vld [vmem:[%s263_s24] sm:$0xff]   ;;  %v1888_v7 = vld [vmem:[%s263_s24 + $0x8] sm:$0xff]   ;;  %v1889_v8 = vld [vmem:[%s263_s24 + $0x10] sm:$0xff]   ;;  %s276_s8 = scalar_lea.vmem %s2761_s1, %s1755_s30  ;;  %s248_s13 = sand.u32 1, %s2365_s16  }
  0x20   : > { %v1858_v9 = vunpack.c.l.bf16 %v1857_v6  ;;  %v1859_v10 = vunpack.c.h.bf16 %v1857_v6  ;;  %v1862_v11 = vunpack.c.l.bf16 %v1888_v7  ;;  %v1863_v12 = vunpack.c.h.bf16 %v1888_v7  ;;  %v1890_v13 = vld [vmem:[%s263_s24 + $0x18] sm:$0xff]   ;;  %v1891_v14 = vld [vmem:[%s263_s24 + $0x20] sm:$0xff]   ;;  %v1892_v15 = vld [vmem:[%s263_s24 + $0x28] sm:$0xff]   ;;  %s2207_s27 = smul.u32 48, %s2377_s19  ;;  %s2708_s9 = scalar_lea.sflag [#allocation4], %s248_s13 }
  0x21   : > { %v1866_v16 = vunpack.c.l.bf16 %v1889_v8  ;;  %v1867_v17 = vunpack.c.h.bf16 %v1889_v8  ;;  %v1870_v18 = vunpack.c.l.bf16 %v1890_v13  ;;  %v1871_v19 = vunpack.c.h.bf16 %v1890_v13  ;;  %v1893_v20 = vld [vmem:[%s263_s24 + $0x30] sm:$0xff]   ;;  %v1894_v21 = vld [vmem:[%s263_s24 + $0x38] sm:$0xff]   ;;  %v328_v30 = vld [vmem:[%s276_s8] sm:$0xf]  ;;  %s1752_s24 = sshll.u32 %s248_s13, 7  ;;  %s2391_s12 = smov [#allocation3]  }
  0x22   : > { %312 = vst.msk [vmem:[#allocation2] sm:$0xff] %vm311_vm0, %v1858_v9  ;;  %313 = vst.msk [vmem:[#allocation2 + $0x8] sm:$0xff] %vm311_vm0, %v1859_v10  ;;  %v1874_v22 = vunpack.c.l.bf16 %v1891_v14  ;;  %v1875_v23 = vunpack.c.h.bf16 %v1891_v14  ;;  %v1878_v24 = vunpack.c.l.bf16 %v1892_v15  ;;  %v1879_v25 = vunpack.c.h.bf16 %v1892_v15  ;;  %s2666_s6 = scalar_lea.vmem [#allocation3], %s1752_s24  ;;  %s1644_s19 = sadd.s32 %s2207_s27, %s2494_s10 }
  0x23   : > { %314 = vst.msk [vmem:[#allocation2 + $0x10] sm:$0xff] %vm311_vm0, %v1862_v11  ;;  %315 = vst.msk [vmem:[#allocation2 + $0x18] sm:$0xff] %vm311_vm0, %v1863_v12  ;;  %v1882_v26 = vunpack.c.l.bf16 %v1893_v20  ;;  %v1883_v27 = vunpack.c.h.bf16 %v1893_v20  ;;  %v1886_v28 = vunpack.c.l.bf16 %v1894_v21  ;;  %v1887_v29 = vunpack.c.h.bf16 %v1894_v21  ;;  %s1853_s30 = sshll.u32 %s1644_s19, 7  ;;  %s1647_s10 = sshll.u32 %s2666_s6, 4  ;;  %s2701_s10 = int_to_ptr.vmem [resolvable:$true] %s1647_s10 }
  0x24   : > { %316 = vst.msk [vmem:[#allocation2 + $0x20] sm:$0xff] %vm311_vm0, %v1866_v16  ;;  %317 = vst.msk [vmem:[#allocation2 + $0x28] sm:$0xff] %vm311_vm0, %v1867_v17  ;;  %v329_v31 = vunpack.c.l.bf16 %v328_v30  ;;  %v2291_v16 = vld [vmem:[%s2762_s2 + $0x58] sm:$0xff]   ;;  %s2698_s8 = scalar_lea.hbm %s2764_s4, %s1853_s30  ;;  %s2295_s11 = scalar_lea.vmem %s2701_s10, 2048 }
  0x25   : > { %318 = vst.msk [vmem:[#allocation2 + $0x30] sm:$0xff] %vm311_vm0, %v1870_v18  ;;  %319 = vst.msk [vmem:[#allocation2 + $0x38] sm:$0xff] %vm311_vm0, %v1871_v19  ;;  %p2296_p1 = scmp.ne.s32.totalorder %s2701_s10, %s2295_s11  ;;  %s2299_s14 = sshll.u32 %s2391_s12, 4  ;;  %s2300_s14 = int_to_ptr.vmem [resolvable:$false] %s2299_s14 }
  0x26   : > { %320 = vst.msk [vmem:[#allocation2 + $0x40] sm:$0xff] %vm311_vm0, %v1874_v22  ;;  %321 = vst.msk [vmem:[#allocation2 + $0x48] sm:$0xff] %vm311_vm0, %v1875_v23  ;;  %s2301_s23 = scalar_lea.vmem %s2300_s14, 4096  ;;  %p2302_p5 = scmp.lt.s32.totalorder %s2701_s10, %s2300_s14 }
  0x27   : > { %322 = vst.msk [vmem:[#allocation2 + $0x50] sm:$0xff] %vm311_vm0, %v1878_v24  ;;  %323 = vst.msk [vmem:[#allocation2 + $0x58] sm:$0xff] %vm311_vm0, %v1879_v25  ;;  %v2597_v25 = vld [vmem:[%s2762_s2 + $0x60] sm:$0xff]   ;;  %p2297_p2 = pnand %p2296_p1, %p2470_p3  ;;  %p2303_p6 = scmp.lt.s32.totalorder %s2301_s23, %s2295_s11 }
  0x28   : > { %324 = vst.msk [vmem:[#allocation2 + $0x60] sm:$0xff] %vm311_vm0, %v1882_v26  ;;  %325 = vst.msk [vmem:[#allocation2 + $0x68] sm:$0xff] %vm311_vm0, %v1883_v27 }
  0x29   : > { %326 = vst.msk [vmem:[#allocation2 + $0x70] sm:$0xff] %vm311_vm0, %v1886_v28  ;;  %327 = vst.msk [vmem:[#allocation2 + $0x78] sm:$0xff] %vm311_vm0, %v1887_v29  ;;  %v359_v32 = vld [vmem:[#allocation2 + $0x1] sm:$0xff]  ;;  %p2298_p4 = pneg %p2297_p2  ;;  %p2304_p7 = por %p2303_p6, %p2302_p5 }
  0x2a   : > { %330 = vst.msk [vmem:[#allocation2 + $0x80] sm:$0xff] %vm311_vm0, %v329_v31  ;;  %v360_v33 = vld [vmem:[#allocation2 + $0x9] sm:$0xff]  ;;  %v361_v37 = vld [vmem:[#allocation2 + $0x11] sm:$0xff]  ;;  %v331_v21 = vld [vmem:[#allocation2] sm:$0xff] }
  0x2b   : > { %v832_v34 = vld [vmem:[#allocation2 + $0x3] sm:$0xff]  ;;  %v375_v35 = vpack.c.bf16 %v360_v33, %v359_v32  ;;  %v833_v36 = vld [vmem:[#allocation2 + $0xb] sm:$0xff]  ;;  %v362_v38 = vld [vmem:[#allocation2 + $0x19] sm:$0xff]  ;;  %p2305_p9 = pnand %p2304_p7, %p2298_p4 }
  0x2c   : > { %v848_v40 = vpack.c.bf16 %v833_v36, %v832_v34  ;;  %v376_v41 = vpack.c.bf16 %v362_v38, %v361_v37  ;;  %v834_v42 = vld [vmem:[#allocation2 + $0x13] sm:$0xff]  ;;  %v835_v43 = vld [vmem:[#allocation2 + $0x1b] sm:$0xff]  ;;  %v364_v46 = vld [vmem:[#allocation2 + $0x29] sm:$0xff] }
  0x2d   : > { %v363_v44 = vld [vmem:[#allocation2 + $0x21] sm:$0xff]  ;;  %1969 = vmatprep.mubr.msk.bf16.mxu1 %vm311_vm0, %v375_v35  ;;  %v849_v45 = vpack.c.bf16 %v835_v43, %v834_v42  ;;  %v837_v48 = vld [vmem:[#allocation2 + $0x2b] sm:$0xff]  ;;  %v366_v54 = vld [vmem:[#allocation2 + $0x39] sm:$0xff] }
  0x2e   : > { %v836_v47 = vld [vmem:[#allocation2 + $0x23] sm:$0xff]  ;;  %2029 = vmatprep.mubr.msk.bf16.mxu0 %vm311_vm0, %v848_v40  ;;  %1970 = vmatmul.mubr.msk.bf16.vlgmr.msra.gmra.mrb[0].mxu1 %vm311_vm0, %v376_v41  ;;  %v377_v49 = vpack.c.bf16 %v364_v46, %v363_v44  ;;  %v365_v53 = vld [vmem:[#allocation2 + $0x31] sm:$0xff]  ;;  %v839_v56 = vld [vmem:[#allocation2 + $0x3b] sm:$0xff] }
  0x2f   : > { %v850_v50 = vpack.c.bf16 %v837_v48, %v836_v47  ;;  %1986 = vmatpush3.bf16.msra.mxu1 %v2522_v4  ;;  %2030 = vmatmul.mubr.msk.bf16.vlgmr.msra.gmra.mrb[0].mxu0 %vm311_vm0, %v849_v45  ;;  %v838_v55 = vld [vmem:[#allocation2 + $0x33] sm:$0xff]  ;;  %v367_v57 = vld [vmem:[#allocation2 + $0x41] sm:$0xff]  ;;  %v368_v58 = vld [vmem:[#allocation2 + $0x49] sm:$0xff]  ;;  %v378_v62 = vpack.c.bf16 %v366_v54, %v365_v53 }
  0x30   : > { %2046 = vmatpush3.bf16.msra.mxu0 %v2527_v5  ;;  %1973 = vmatprep.mubr.msk.bf16.mxu1 %vm311_vm0, %v377_v49  ;;  %v1010_v59 = vld [vmem:[#allocation2 + $0x4] sm:$0xff]  ;;  %v1011_v60 = vld [vmem:[#allocation2 + $0xc] sm:$0xff]  ;;  %v851_v63 = vpack.c.bf16 %v839_v56, %v838_v55  ;;  %v379_v0 = vpack.c.bf16 %v368_v58, %v367_v57  ;;  %v370_v5 = vld [vmem:[#allocation2 + $0x59] sm:$0xff] }
  0x31   : > { %2033 = vmatprep.mubr.msk.bf16.mxu0 %vm311_vm0, %v850_v50  ;;  %2047 = vmatprep.subr.bf16.mxu0 %v2287_v39  ;;  %v1026_v2 = vpack.c.bf16 %v1011_v60, %v1010_v59  ;;  %v369_v4 = vld [vmem:[#allocation2 + $0x51] sm:$0xff]  ;;  %v1013_v7 = vld [vmem:[#allocation2 + $0x1c] sm:$0xff]  ;;  %v372_v9 = vld [vmem:[#allocation2 + $0x69] sm:$0xff] }
  0x32   : > { %1987 = vmatprep.subr.bf16.mxu1 %v2288_v51  ;;  %v1012_v6 = vld [vmem:[#allocation2 + $0x14] sm:$0xff]  ;;  %v371_v8 = vld [vmem:[#allocation2 + $0x61] sm:$0xff]  ;;  %v1015_v11 = vld [vmem:[#allocation2 + $0x2c] sm:$0xff]  ;;  %v380_v12 = vpack.c.bf16 %v370_v5, %v369_v4 }
  0x33   : > { %1988 = vmatpush3.bf16.msra.mxu1 %v2288_v51  ;;  %v1014_v10 = vld [vmem:[#allocation2 + $0x24] sm:$0xff]  ;;  %v1027_v13 = vpack.c.bf16 %v1013_v7, %v1012_v6  ;;  %v381_v14 = vpack.c.bf16 %v372_v9, %v371_v8  ;;  %v373_v17 = vld [vmem:[#allocation2 + $0x71] sm:$0xff]  ;;  %v374_v18 = vld [vmem:[#allocation2 + $0x79] sm:$0xff] }
  0x34   : > { %2048 = vmatpush3.bf16.msra.mxu0 %v2287_v39  ;;  %2005 = vmatprep.subr.bf16.mxu1 %v2572_v52  ;;  %v1028_v15 = vpack.c.bf16 %v1015_v11, %v1014_v10  ;;  %v1016_v19 = vld [vmem:[#allocation2 + $0x34] sm:$0xff]  ;;  %v1017_v20 = vld [vmem:[#allocation2 + $0x3c] sm:$0xff]  ;;  %v332_v22 = vld [vmem:[#allocation2 + $0x8] sm:$0xff]  ;;  %v382_v26 = vpack.c.bf16 %v374_v18, %v373_v17 }
  0x35   : > { %2065 = vmatprep.subr.bf16.mxu0 %v2289_v61  ;;  %v1018_v23 = vld [vmem:[#allocation2 + $0x44] sm:$0xff]  ;;  %v1019_v24 = vld [vmem:[#allocation2 + $0x4c] sm:$0xff]  ;;  %v1029_v27 = vpack.c.bf16 %v1017_v20, %v1016_v19  ;;  %v347_v28 = vpack.c.bf16 %v332_v22, %v331_v21  ;;  %v334_v31 = vld [vmem:[#allocation2 + $0x18] sm:$0xff] }
  0x36   : > { %1974 = vmatmul.mubr.msk.bf16.gmra.mrb[4].mxu1 %vm311_vm0, %v378_v62  ;;  %v1030_v29 = vpack.c.bf16 %v1019_v24, %v1018_v23  ;;  %v333_v30 = vld [vmem:[#allocation2 + $0x10] sm:$0xff]  ;;  %v1021_v33 = vld [vmem:[#allocation2 + $0x5c] sm:$0xff]  ;;  %v336_v35 = vld [vmem:[#allocation2 + $0x28] sm:$0xff] }
  0x37   : > { %2034 = vmatmul.mubr.msk.bf16.gmra.mrb[4].mxu0 %vm311_vm0, %v851_v63  ;;  %1977 = vmatprep.mubr.msk.bf16.mxu1 %vm311_vm0, %v379_v0  ;;  %v1020_v32 = vld [vmem:[#allocation2 + $0x54] sm:$0xff]  ;;  %v335_v34 = vld [vmem:[#allocation2 + $0x20] sm:$0xff]  ;;  %v1023_v37 = vld [vmem:[#allocation2 + $0x6c] sm:$0xff]  ;;  %v348_v38 = vpack.c.bf16 %v334_v31, %v333_v30 }
  0x38   : > { %2049 = vmatprep.mubr.msk.bf16.mxu0 %vm311_vm0, %v1026_v2  ;;  %v1022_v36 = vld [vmem:[#allocation2 + $0x64] sm:$0xff]  ;;  %v1031_v39 = vpack.c.bf16 %v1021_v33, %v1020_v32  ;;  %v349_v40 = vpack.c.bf16 %v336_v35, %v335_v34  ;;  %v337_v43 = vld [vmem:[#allocation2 + $0x30] sm:$0xff]  ;;  %v338_v44 = vld [vmem:[#allocation2 + $0x38] sm:$0xff] }
  0x39   : > { %v1032_v41 = vpack.c.bf16 %v1023_v37, %v1022_v36  ;;  %v2292_v42 = vld [vmem:[%s2762_s2 + $0x28] sm:$0xff]   ;;  %v1024_v45 = vld [vmem:[#allocation2 + $0x74] sm:$0xff]  ;;  %v340_v48 = vld [vmem:[#allocation2 + $0x48] sm:$0xff]  ;;  %v350_v51 = vpack.c.bf16 %v338_v44, %v337_v43 }
  0x3a   : > { %v1025_v46 = vld [vmem:[#allocation2 + $0x7c] sm:$0xff]  ;;  %v1188_v49 = vld [vmem:[#allocation2 + $0x5] sm:$0xff]  ;;  %v1189_v50 = vld [vmem:[#allocation2 + $0xd] sm:$0xff] }
  0x3b   : > { %v339_v47 = vld [vmem:[#allocation2 + $0x40] sm:$0xff]  ;;  %v1033_v53 = vpack.c.bf16 %v1025_v46, %v1024_v45  ;;  %v341_v55 = vld [vmem:[#allocation2 + $0x50] sm:$0xff]  ;;  %v342_v56 = vld [vmem:[#allocation2 + $0x58] sm:$0xff] }
  0x3c   : > { %v351_v54 = vpack.c.bf16 %v340_v48, %v339_v47  ;;  %v1190_v57 = vld [vmem:[#allocation2 + $0x15] sm:$0xff]  ;;  %v1191_v58 = vld [vmem:[#allocation2 + $0x1d] sm:$0xff]  ;;  %v344_v60 = vld [vmem:[#allocation2 + $0x68] sm:$0xff]  ;;  %v352_v63 = vpack.c.bf16 %v342_v56, %v341_v55 }
  0x3d   : > { %v343_v59 = vld [vmem:[#allocation2 + $0x60] sm:$0xff]  ;;  %v1193_v62 = vld [vmem:[#allocation2 + $0x2d] sm:$0xff]  ;;  %v1205_v0 = vpack.c.bf16 %v1191_v58, %v1190_v57  ;;  %v346_v7 = vld [vmem:[#allocation2 + $0x78] sm:$0xff] }
  0x3e   : > { %1978 = vmatmul.mubr.msk.bf16.gmra.mrb[8].mxu1 %vm311_vm0, %v380_v12  ;;  %v353_v2 = vpack.c.bf16 %v344_v60, %v343_v59  ;;  %v2294_v5 = vld [vmem:[%s2762_s2 + $0x68] sm:$0xff]   ;;  %v345_v6 = vld [vmem:[#allocation2 + $0x70] sm:$0xff] }
  0x3f   : > { %2050 = vmatmul.mubr.msk.bf16.vlgmr.msra.gmra.mrb[0].mxu0 %vm311_vm0, %v1027_v13  ;;  %1981 = vmatprep.mubr.msk.bf16.mxu1 %vm311_vm0, %v381_v14  ;;  %v1194_v8 = vld [vmem:[#allocation2 + $0x35] sm:$0xff]  ;;  %v1195_v9 = vld [vmem:[#allocation2 + $0x3d] sm:$0xff]  ;;  %v655_v11 = vld [vmem:[#allocation2 + $0xa] sm:$0xff]  ;;  %v354_v14 = vpack.c.bf16 %v346_v7, %v345_v6 }
  0x40   : > { %2066 = vmatpush3.bf16.msra.mxu0 %v2289_v61  ;;  %2053 = vmatprep.mubr.msk.bf16.mxu0 %vm311_vm0, %v1028_v15  ;;  %v1192_v61 = vld [vmem:[#allocation2 + $0x25] sm:$0xff]  ;;  %v1197_v13 = vld [vmem:[#allocation2 + $0x4d] sm:$0xff]  ;;  %v1207_v15 = vpack.c.bf16 %v1195_v9, %v1194_v8  ;;  %v657_v19 = vld [vmem:[#allocation2 + $0x1a] sm:$0xff] }
  0x41   : > { %2067 = vmatprep.subr.bf16.mxu0 %v2291_v16  ;;  %v1206_v4 = vpack.c.bf16 %v1193_v62, %v1192_v61  ;;  %v654_v10 = vld [vmem:[#allocation2 + $0x2] sm:$0xff]  ;;  %v656_v18 = vld [vmem:[#allocation2 + $0x12] sm:$0xff]  ;;  %v659_v23 = vld [vmem:[#allocation2 + $0x2a] sm:$0xff] }
  0x42   : > { %v1196_v12 = vld [vmem:[#allocation2 + $0x45] sm:$0xff]  ;;  %v1198_v20 = vld [vmem:[#allocation2 + $0x55] sm:$0xff]  ;;  %v1199_v21 = vld [vmem:[#allocation2 + $0x5d] sm:$0xff] }
  0x43   : > { %v1208_v17 = vpack.c.bf16 %v1197_v13, %v1196_v12  ;;  %v658_v22 = vld [vmem:[#allocation2 + $0x22] sm:$0xff]  ;;  %v660_v30 = vld [vmem:[#allocation2 + $0x32] sm:$0xff]  ;;  %v661_v31 = vld [vmem:[#allocation2 + $0x3a] sm:$0xff] }
  0x44   : > { %2068 = vmatpush3.bf16.msra.mxu0 %v2291_v16  ;;  %v670_v16 = vpack.c.bf16 %v655_v11, %v654_v10  ;;  %v1200_v24 = vld [vmem:[#allocation2 + $0x65] sm:$0xff]  ;;  %v1202_v32 = vld [vmem:[#allocation2 + $0x75] sm:$0xff]  ;;  %v1203_v33 = vld [vmem:[#allocation2 + $0x7d] sm:$0xff] }
  0x45   : > { %2085 = vmatprep.subr.bf16.mxu0 %v2597_v25  ;;  %v662_v34 = vld [vmem:[#allocation2 + $0x42] sm:$0xff]  ;;  %v663_v35 = vld [vmem:[#allocation2 + $0x4a] sm:$0xff]  ;;  %v1368_v43 = vld [vmem:[#allocation2 + $0x16] sm:$0xff] }
  0x46   : > { %1982 = vmatmul.mubr.msk.bf16.gmra.mrb[12].mxu1 %vm311_vm0, %v382_v26  ;;  %v671_v26 = vpack.c.bf16 %v657_v19, %v656_v18  ;;  %v1366_v36 = vld [vmem:[#allocation2 + $0x6] sm:$0xff]  ;;  %v1367_v37 = vld [vmem:[#allocation2 + $0xe] sm:$0xff]  ;;  %v1369_v44 = vld [vmem:[#allocation2 + $0x1e] sm:$0xff] }
  0x47   : > { %2054 = vmatmul.mubr.msk.bf16.gmra.mrb[4].mxu0 %vm311_vm0, %v1029_v27  ;;  %1989 = vmatprep.mubr.msk.bf16.mxu1 %vm311_vm0, %v347_v28  ;;  %v1209_v27 = vpack.c.bf16 %v1199_v21, %v1198_v20  ;;  %v672_v28 = vpack.c.bf16 %v659_v23, %v658_v22  ;;  %v666_v45 = vld [vmem:[#allocation2 + $0x62] sm:$0xff]  ;;  %v667_v46 = vld [vmem:[#allocation2 + $0x6a] sm:$0xff] }
  0x48   : > { %2057 = vmatprep.mubr.msk.bf16.mxu0 %vm311_vm0, %v1030_v29  ;;  %v1370_v47 = vld [vmem:[#allocation2 + $0x26] sm:$0xff]  ;;  %v1371_v48 = vld [vmem:[#allocation2 + $0x2e] sm:$0xff]  ;;  %v1373_v55 = vld [vmem:[#allocation2 + $0x3e] sm:$0xff] }
  0x49   : > { %v840_v56 = vld [vmem:[#allocation2 + $0x43] sm:$0xff]  ;;  %v841_v57 = vld [vmem:[#allocation2 + $0x4b] sm:$0xff] }
  0x4a   : > { %v1374_v58 = vld [vmem:[#allocation2 + $0x46] sm:$0xff]  ;;  %v1375_v59 = vld [vmem:[#allocation2 + $0x4e] sm:$0xff]  ;;  %v852_v62 = vpack.c.bf16 %v841_v57, %v840_v56 }
  0x4b   : > { %v844_v6 = vld [vmem:[#allocation2 + $0x63] sm:$0xff]  ;;  %v845_v7 = vld [vmem:[#allocation2 + $0x6b] sm:$0xff] }
  0x4c   : > { %v1378_v8 = vld [vmem:[#allocation2 + $0x66] sm:$0xff]  ;;  %v1379_v9 = vld [vmem:[#allocation2 + $0x6e] sm:$0xff]  ;;  %v854_v12 = vpack.c.bf16 %v845_v7, %v844_v6 }
  0x4d   : > { %v1388_v13 = vpack.c.bf16 %v1379_v9, %v1378_v8 }
  0x4e   : > { %1990 = vmatmul.mubr.msk.bf16.vlgmr.msra.gmra.mrb[0].mxu1 %vm311_vm0, %v348_v38  ;;  %v673_v38 = vpack.c.bf16 %v661_v31, %v660_v30 }
  0x4f   : > { %2006 = vmatpush3.bf16.msra.mxu1 %v2572_v52  ;;  %2058 = vmatmul.mubr.msk.bf16.gmra.mrb[8].mxu0 %vm311_vm0, %v1031_v39  ;;  %v1204_v52 = vpack.c.bf16 %v1189_v50, %v1188_v49  ;;  %v1211_v39 = vpack.c.bf16 %v1203_v33, %v1202_v32  ;;  %v1383_v50 = vpack.c.bf16 %v1369_v44, %v1368_v43 }
  0x50   : > { %1993 = vmatprep.mubr.msk.bf16.mxu1 %vm311_vm0, %v349_v40  ;;  %2061 = vmatprep.mubr.msk.bf16.mxu0 %vm311_vm0, %v1032_v41  ;;  %v674_v40 = vpack.c.bf16 %v663_v35, %v662_v34  ;;  %v664_v41 = vld [vmem:[#allocation2 + $0x52] sm:$0xff] }
  0x51   : > { %2007 = vmatprep.subr.bf16.mxu1 %v2292_v42 }
  0x53   : > { %2008 = vmatpush3.bf16.msra.mxu1 %v2292_v42  ;;  %v665_v42 = vld [vmem:[#allocation2 + $0x5a] sm:$0xff] }
  0x54   : > { %2105 = vmatprep.subr.bf16.mxu1 %v2499_v1  ;;  %v675_v49 = vpack.c.bf16 %v665_v42, %v664_v41 }
  0x56   : > { %1994 = vmatmul.mubr.msk.bf16.gmra.mrb[4].mxu1 %vm311_vm0, %v350_v51  ;;  %v1384_v51 = vpack.c.bf16 %v1371_v48, %v1370_v47 }
  0x57   : > { %2062 = vmatmul.mubr.msk.bf16.gmra.mrb[12].mxu0 %vm311_vm0, %v1033_v53  ;;  %1997 = vmatprep.mubr.msk.bf16.mxu1 %vm311_vm0, %v351_v54  ;;  %v668_v53 = vld [vmem:[#allocation2 + $0x72] sm:$0xff]  ;;  %v669_v54 = vld [vmem:[#allocation2 + $0x7a] sm:$0xff] }
  0x58   : > { %2069 = vmatprep.mubr.msk.bf16.mxu0 %vm311_vm0, %v1204_v52  ;;  %v1372_v52 = vld [vmem:[#allocation2 + $0x36] sm:$0xff]  ;;  %v677_v60 = vpack.c.bf16 %v669_v54, %v668_v53 }
  0x59   : > { %v1385_v61 = vpack.c.bf16 %v1373_v55, %v1372_v52 }
  0x5e   : > { %1998 = vmatmul.mubr.msk.bf16.gmra.mrb[8].mxu1 %vm311_vm0, %v352_v63  ;;  %v1386_v63 = vpack.c.bf16 %v1375_v59, %v1374_v58 }
  0x5f   : > { %2070 = vmatmul.mubr.msk.bf16.vlgmr.msra.gmra.mrb[0].mxu0 %vm311_vm0, %v1205_v0  ;;  %2001 = vmatprep.mubr.msk.bf16.mxu1 %vm311_vm0, %v353_v2  ;;  %v842_v0 = vld [vmem:[#allocation2 + $0x53] sm:$0xff]  ;;  %v843_v2 = vld [vmem:[#allocation2 + $0x5b] sm:$0xff] }
  0x60   : > { %2086 = vmatpush3.bf16.msra.mxu0 %v2597_v25  ;;  %2073 = vmatprep.mubr.msk.bf16.mxu0 %vm311_vm0, %v1206_v4  ;;  %v1201_v25 = vld [vmem:[#allocation2 + $0x6d] sm:$0xff]  ;;  %v1376_v4 = vld [vmem:[#allocation2 + $0x56] sm:$0xff]  ;;  %v853_v10 = vpack.c.bf16 %v843_v2, %v842_v0 }
  0x61   : > { %2087 = vmatprep.subr.bf16.mxu0 %v2294_v5  ;;  %v1210_v29 = vpack.c.bf16 %v1201_v25, %v1200_v24 }
  0x64   : > { %2088 = vmatpush3.bf16.msra.mxu0 %v2294_v5  ;;  %v1377_v5 = vld [vmem:[#allocation2 + $0x5e] sm:$0xff] }
  0x65   : > { %v1387_v11 = vpack.c.bf16 %v1377_v5, %v1376_v4 }
  0x66   : > { %2002 = vmatmul.mubr.msk.bf16.gmra.mrb[12].mxu1 %vm311_vm0, %v354_v14  ;;  %v846_v14 = vld [vmem:[#allocation2 + $0x73] sm:$0xff] }
  0x67   : > { %2074 = vmatmul.mubr.msk.bf16.gmra.mrb[4].mxu0 %vm311_vm0, %v1207_v15  ;;  %2009 = vmatprep.mubr.msk.bf16.mxu1 %vm311_vm0, %v670_v16  ;;  %v847_v15 = vld [vmem:[#allocation2 + $0x7b] sm:$0xff] }
  0x68   : > { %2077 = vmatprep.mubr.msk.bf16.mxu0 %vm311_vm0, %v1208_v17  ;;  %v1380_v16 = vld [vmem:[#allocation2 + $0x76] sm:$0xff]  ;;  %v1381_v17 = vld [vmem:[#allocation2 + $0x7e] sm:$0xff]  ;;  %v855_v18 = vpack.c.bf16 %v847_v15, %v846_v14 }
  0x69   : > { %v1389_v19 = vpack.c.bf16 %v1381_v17, %v1380_v16 }
  0x6e   : > { %2010 = vmatmul.mubr.msk.bf16.vlgmr.msra.gmra.mrb[0].mxu1 %vm311_vm0, %v671_v26 }
  0x6f   : > { %2107 = vmatpush3.bf16.msra.mxu1 %v2499_v1  ;;  %2078 = vmatmul.mubr.msk.bf16.gmra.mrb[8].mxu0 %vm311_vm0, %v1209_v27  ;;  %v1382_v1 = vpack.c.bf16 %v1367_v37, %v1366_v36 }
  0x70   : > { %2013 = vmatprep.mubr.msk.bf16.mxu1 %vm311_vm0, %v672_v28  ;;  %2081 = vmatprep.mubr.msk.bf16.mxu0 %vm311_vm0, %v1210_v29  ;;  %v2658_v29 = vld [vmem:[%s2763_s3] ss:$0 sm:$0xff] }
  0x71   : > { %2106 = vmatprep.subr.bf16.mxu1 %v2510_v3 }
  0x73   : > { %2108 = vmatpush3.bf16.msra.mxu1 %v2510_v3  ;;  %v676_v3 = vpack.c.bf16 %v667_v46, %v666_v45 }
  0x76   : > { %2014 = vmatmul.mubr.msk.bf16.gmra.mrb[4].mxu1 %vm311_vm0, %v673_v38 }
  0x77   : > { %2082 = vmatmul.mubr.msk.bf16.gmra.mrb[12].mxu0 %vm311_vm0, %v1211_v39  ;;  %2017 = vmatprep.mubr.msk.bf16.mxu1 %vm311_vm0, %v674_v40 }
  0x78   : > { %2089 = vmatprep.mubr.msk.bf16.mxu0 %vm311_vm0, %v1382_v1 }
  0x7e   : > { %2018 = vmatmul.mubr.msk.bf16.gmra.mrb[8].mxu1 %vm311_vm0, %v675_v49 }
  0x7f   : > { %2090 = vmatmul.mubr.msk.bf16.vlgmr.msra.gmra.mrb[0].mxu0 %vm311_vm0, %v1383_v50  ;;  %2021 = vmatprep.mubr.msk.bf16.mxu1 %vm311_vm0, %v676_v3 }
  0x80   : > { %2093 = vmatprep.mubr.msk.bf16.mxu0 %vm311_vm0, %v1384_v51 }
  0x86   : > { %2022 = vmatmul.mubr.msk.bf16.gmra.mrb[12].mxu1 %vm311_vm0, %v677_v60 }
  0x87   : > { %2094 = vmatmul.mubr.msk.bf16.gmra.mrb[4].mxu0 %vm311_vm0, %v1385_v61  ;;  %2037 = vmatprep.mubr.msk.bf16.mxu1 %vm311_vm0, %v852_v62 }
  0x88   : > { %2097 = vmatprep.mubr.msk.bf16.mxu0 %vm311_vm0, %v1386_v63 }
  0x8e   : > { %2038 = vmatmul.mubr.msk.bf16.vlgmr.msra.gmra.mrb[8].mxu1 %vm311_vm0, %v853_v10 }
  0x8f   : > { %2098 = vmatmul.mubr.msk.bf16.gmra.mrb[8].mxu0 %vm311_vm0, %v1387_v11  ;;  %2041 = vmatprep.mubr.msk.bf16.mxu1 %vm311_vm0, %v854_v12 }
  0x90   : > { %2101 = vmatprep.mubr.msk.bf16.mxu0 %vm311_vm0, %v1388_v13 }
  0x96   : > { %2042 = vmatmul.mubr.msk.bf16.gmra.mrb[12].mxu1 %vm311_vm0, %v855_v18 }
  0x97   : > { %2102 = vmatmul.mubr.msk.bf16.gmra.mrb[12].mxu0 %vm311_vm0, %v1389_v19 }
 0x141   : > { %v2011_v20 = vpop.f32.mrb[0].mxu1 }
 0x142   : > { %v753_v21 = vpop.f32.mrb[1].mxu1 }
 0x143   : > { %v2012_v22 = vpop.f32.mrb[2].mxu1 }
 0x144   : > { %v756_v23 = vpop.f32.mrb[3].mxu1 }
 0x149   : > { %v2015_v24 = vpop.f32.mrb[4].mxu1 }
 0x14a   : > { %v769_v25 = vpop.f32.mrb[5].mxu1 }
 0x14b   : > { %v2016_v26 = vpop.f32.mrb[6].mxu1 }
 0x14c   : > { %v772_v27 = vpop.f32.mrb[7].mxu1 }
 0x152   : > { %v2091_v28 = vpop.f32.mrb[0].mxu0 }
 0x153   : > { %v2109_v30 = vadd.f32 %v2091_v28, %v2011_v20  ;;  %v1465_v31 = vpop.f32.mrb[1].mxu0 }
 0x154   : > { %v2110_v32 = vadd.f32 %v1465_v31, %v753_v21  ;;  %v2092_v33 = vpop.f32.mrb[2].mxu0 }
 0x155   : > { %v1553_v34 = vadd.f32 %v2109_v30, %v2658_v29  ;;  %v2111_v35 = vadd.f32 %v2092_v33, %v2012_v22  ;;  %v1468_v36 = vpop.f32.mrb[3].mxu0 }
 0x156   : > { %v1551_v37 = vadd.f32 %v2110_v32, %v2658_v29  ;;  %v2112_v38 = vadd.f32 %v1468_v36, %v756_v23 }
 0x157   : > { %vm1569_vm1 = vcmp.ge.f32.partialorder %v1553_v34, 0.0  ;;  %v1585_v39 = vmul.f32 0.01, %v1553_v34  ;;  %v1554_v40 = vadd.f32 %v2111_v35, %v2658_v29 }
 0x158   : > { %vm1567_vm2 = vcmp.ge.f32.partialorder %v1551_v37, 0.0  ;;  %v1583_v1 = vmul.f32 0.01, %v1551_v37  ;;  %v1552_v41 = vadd.f32 %v2112_v38, %v2658_v29 }
 0x159   : > { %v1601_v42 = vsel %vm1569_vm1, %v1553_v34, %v1585_v39  ;;  %vm1570_vm3 = vcmp.ge.f32.partialorder %v1554_v40, 0.0  ;;  %v1586_v43 = vmul.f32 0.01, %v1554_v40 }
 0x15a   : > { %1617 = vst [vmem:[%s2666_s6 + $0x10] sm:$0xff] %v1601_v42  ;;  %v1599_v44 = vsel %vm1567_vm2, %v1551_v37, %v1583_v1  ;;  %vm1568_vm4 = vcmp.ge.f32.partialorder %v1552_v41, 0.0  ;;  %v1584_v45 = vmul.f32 0.01, %v1552_v41  ;;  %v2095_v46 = vpop.f32.mrb[4].mxu0 }
 0x15b   : > { %1615 = vst [vmem:[%s2666_s6] sm:$0xff] %v1599_v44  ;;  %v1602_v47 = vsel %vm1570_vm3, %v1554_v40, %v1586_v43  ;;  %v2113_v48 = vadd.f32 %v2095_v46, %v2015_v24  ;;  %v1481_v49 = vpop.f32.mrb[5].mxu0 }
 0x15c   : > { %1618 = vst [vmem:[%s2666_s6 + $0x18] sm:$0xff] %v1602_v47  ;;  %v1600_v50 = vsel %vm1568_vm4, %v1552_v41, %v1584_v45  ;;  %v2114_v3 = vadd.f32 %v1481_v49, %v769_v25  ;;  %v2096_v51 = vpop.f32.mrb[6].mxu0 }
 0x15d   : > { %1616 = vst [vmem:[%s2666_s6 + $0x8] sm:$0xff] %v1600_v50  ;;  %v1557_v53 = vadd.f32 %v2113_v48, %v2658_v29  ;;  %v2115_v54 = vadd.f32 %v2096_v51, %v2016_v26  ;;  %v1484_v52 = vpop.f32.mrb[7].mxu0 }
 0x15e   : > { %v1555_v55 = vadd.f32 %v2114_v3, %v2658_v29  ;;  %v2116_v56 = vadd.f32 %v1484_v52, %v772_v27 }
 0x15f   : > { %vm1573_vm5 = vcmp.ge.f32.partialorder %v1557_v53, 0.0  ;;  %v1589_v57 = vmul.f32 0.01, %v1557_v53  ;;  %v1558_v58 = vadd.f32 %v2115_v54, %v2658_v29 }
 0x160   : > { %vm1571_vm6 = vcmp.ge.f32.partialorder %v1555_v55, 0.0  ;;  %v1587_v59 = vmul.f32 0.01, %v1555_v55  ;;  %v1556_v60 = vadd.f32 %v2116_v56, %v2658_v29 }
 0x161   : > { %v1605_v61 = vsel %vm1573_vm5, %v1557_v53, %v1589_v57  ;;  %vm1574_vm7 = vcmp.ge.f32.partialorder %v1558_v58, 0.0  ;;  %v1590_v62 = vmul.f32 0.01, %v1558_v58  ;;  %v2039_v63 = vpop.f32.mrb[8].mxu1 }
 0x162   : > { %1621 = vst [vmem:[%s2666_s6 + $0x30] sm:$0xff] %v1605_v61  ;;  %v1603_v0 = vsel %vm1571_vm6, %v1555_v55, %v1587_v59  ;;  %vm1572_vm8 = vcmp.ge.f32.partialorder %v1556_v60, 0.0  ;;  %v1588_v2 = vmul.f32 0.01, %v1556_v60  ;;  %v2099_v4 = vpop.f32.mrb[8].mxu0  ;;  %v963_v5 = vpop.f32.mrb[9].mxu1 }
 0x163   : > { %1619 = vst [vmem:[%s2666_s6 + $0x20] sm:$0xff] %v1603_v0  ;;  %v1606_v6 = vsel %vm1574_vm7, %v1558_v58, %v1590_v62  ;;  %v2117_v7 = vadd.f32 %v2099_v4, %v2039_v63  ;;  %v1497_v8 = vpop.f32.mrb[9].mxu0  ;;  %v2040_v9 = vpop.f32.mrb[10].mxu1 }
 0x164   : > { %1622 = vst [vmem:[%s2666_s6 + $0x38] sm:$0xff] %v1606_v6  ;;  %v1604_v10 = vsel %vm1572_vm8, %v1556_v60, %v1588_v2  ;;  %v2118_v11 = vadd.f32 %v1497_v8, %v963_v5  ;;  %v2100_v12 = vpop.f32.mrb[10].mxu0  ;;  %v966_v13 = vpop.f32.mrb[11].mxu1 }
 0x165   : > { %1620 = vst [vmem:[%s2666_s6 + $0x28] sm:$0xff] %v1604_v10  ;;  %v1561_v14 = vadd.f32 %v2117_v7, %v2658_v29  ;;  %v2119_v15 = vadd.f32 %v2100_v12, %v2040_v9  ;;  %v1500_v16 = vpop.f32.mrb[11].mxu0 }
 0x166   : > { %v1559_v17 = vadd.f32 %v2118_v11, %v2658_v29  ;;  %v2120_v18 = vadd.f32 %v1500_v16, %v966_v13 }
 0x167   : > { %vm1577_vm9 = vcmp.ge.f32.partialorder %v1561_v14, 0.0  ;;  %v1593_v19 = vmul.f32 0.01, %v1561_v14  ;;  %v1562_v20 = vadd.f32 %v2119_v15, %v2658_v29 }
 0x168   : > { %vm1575_vm10 = vcmp.ge.f32.partialorder %v1559_v17, 0.0  ;;  %v1591_v21 = vmul.f32 0.01, %v1559_v17  ;;  %v1560_v22 = vadd.f32 %v2120_v18, %v2658_v29 }
 0x169   : > { %v1609_v23 = vsel %vm1577_vm9, %v1561_v14, %v1593_v19  ;;  %vm1578_vm11 = vcmp.ge.f32.partialorder %v1562_v20, 0.0  ;;  %v1594_v24 = vmul.f32 0.01, %v1562_v20  ;;  %v2043_v25 = vpop.f32.mrb[12].mxu1 }
 0x16a   : > { %1625 = vst [vmem:[%s2666_s6 + $0x50] sm:$0xff] %v1609_v23  ;;  %v1607_v26 = vsel %vm1575_vm10, %v1559_v17, %v1591_v21  ;;  %vm1576_vm12 = vcmp.ge.f32.partialorder %v1560_v22, 0.0  ;;  %v1592_v27 = vmul.f32 0.01, %v1560_v22  ;;  %v2103_v28 = vpop.f32.mrb[12].mxu0  ;;  %v979_v30 = vpop.f32.mrb[13].mxu1 }
 0x16b   : > { %1623 = vst [vmem:[%s2666_s6 + $0x40] sm:$0xff] %v1607_v26  ;;  %v1610_v31 = vsel %vm1578_vm11, %v1562_v20, %v1594_v24  ;;  %v2121_v32 = vadd.f32 %v2103_v28, %v2043_v25  ;;  %v1513_v33 = vpop.f32.mrb[13].mxu0  ;;  %v2044_v34 = vpop.f32.mrb[14].mxu1 }
 0x16c   : > { %1626 = vst [vmem:[%s2666_s6 + $0x58] sm:$0xff] %v1610_v31  ;;  %v1608_v35 = vsel %vm1576_vm12, %v1560_v22, %v1592_v27  ;;  %v2122_v36 = vadd.f32 %v1513_v33, %v979_v30  ;;  %v2104_v37 = vpop.f32.mrb[14].mxu0  ;;  %v982_v38 = vpop.f32.mrb[15].mxu1 }
 0x16d   : > { %1624 = vst [vmem:[%s2666_s6 + $0x48] sm:$0xff] %v1608_v35  ;;  %v1565_v39 = vadd.f32 %v2121_v32, %v2658_v29  ;;  %v2123_v40 = vadd.f32 %v2104_v37, %v2044_v34  ;;  %v1516_v1 = vpop.f32.mrb[15].mxu0 }
 0x16e   : > { %v1563_v41 = vadd.f32 %v2122_v36, %v2658_v29  ;;  %v2124_v42 = vadd.f32 %v1516_v1, %v982_v38 }
 0x16f   : > { %vm1581_vm13 = vcmp.ge.f32.partialorder %v1565_v39, 0.0  ;;  %v1597_v43 = vmul.f32 0.01, %v1565_v39  ;;  %v1566_v44 = vadd.f32 %v2123_v40, %v2658_v29 }
 0x170   : > { %vm1579_vm14 = vcmp.ge.f32.partialorder %v1563_v41, 0.0  ;;  %v1595_v45 = vmul.f32 0.01, %v1563_v41  ;;  %v1564_v46 = vadd.f32 %v2124_v42, %v2658_v29 }
 0x171   : > { %v1613_v47 = vsel %vm1581_vm13, %v1565_v39, %v1597_v43  ;;  %vm1582_vm15 = vcmp.ge.f32.partialorder %v1566_v44, 0.0  ;;  %v1598_v48 = vmul.f32 0.01, %v1566_v44 }
 0x172   : > { %1629 = vst [vmem:[%s2666_s6 + $0x70] sm:$0xff] %v1613_v47  ;;  %v1611_v49 = vsel %vm1579_vm14, %v1563_v41, %v1595_v45  ;;  %vm1580_vm0 = vcmp.ge.f32.partialorder %v1564_v46, 0.0  ;;  %v1596_v50 = vmul.f32 0.01, %v1564_v46 }
 0x173   : > { %1627 = vst [vmem:[%s2666_s6 + $0x60] sm:$0xff] %v1611_v49  ;;  %v1614_v29 = vsel %vm1582_vm15, %v1566_v44, %v1598_v48 }
 0x174   : > { %1630 = vst [vmem:[%s2666_s6 + $0x78] sm:$0xff] %v1614_v29  ;;  %v1612_v3 = vsel %vm1580_vm0, %v1564_v46, %v1596_v50 }
 0x175   : > { %1628 = vst [vmem:[%s2666_s6 + $0x68] sm:$0xff] %v1612_v3 }
 0x176   : > { %2308 = shalt.err (!%p2305_p9)
}
 0x177   : > { %s2309_s13 = scalar_lea.hbm %s2698_s8, 2048  ;;  %s2313_s27 = scalar_lea.hbm %s2764_s4, 12288 }
 0x178   : > { %p2310_p10 = scmp.ne.s32.totalorder %s2698_s8, %s2309_s13  ;;  %p2314_p13 = scmp.lt.u32.totalorder %s2698_s8, %s2764_s4 }
 0x179   : > { %p2315_p0 = scmp.lt.u32.totalorder %s2313_s27, %s2309_s13  ;;  %p2317_p2 = scmp.lt.u32.totalorder %s2309_s13, %s2698_s8 }
 0x17a   : > { %p2311_p11 = pnand %p2310_p10, %p2470_p3 }
 0x17b   : > { %p2316_p1 = por %p2315_p0, %p2314_p13 }
 0x17c   : > { %p2312_p12 = pneg %p2311_p11 }
 0x17d   : > { %p2318_p4 = por %p2317_p2, %p2316_p1 }
 0x17f   : > { %p2319_p5 = pnand %p2318_p4, %p2312_p12 }
 0x181   : > { %2322 = shalt.err (!%p2319_p5)
}
 0x182   : > { %s2392_s18 = smov 128   ;;  %s2393_s5 = smov 8  }
 0x183   : > { %2208 = dma.vmem_to_hbm [thread:$0]  (%p2470_p3), %s2701_s10, 2048, %s2698_s8, %s2708_s9, %s2392_s18, %s2392_s18, %s2393_s5  }
 0x184 PF: > { %p2214_p6 = scmp.ge.s32.totalorder %s2389_s22, 2  ;;  %s1662_s11 = sand.u32 1, %s2361_s15  }
 0x185   : > { %s1663_s12 = scalar_lea.sflag [#allocation4], %s1662_s11 }
 0x186   : > { %p2211_p7 = pnand %p2214_p6, %p2479_p8 }
 0x188   : > { %2356 = dma.done.wait (!%p2211_p7), %s1663_s12, 2048  }
 0x189   : > { %2358 = vsyncadd (!%p2211_p7), %s1663_s12, 4294965248  ;;  %s17_s22 = sadd.s32 1, %s2389_s22   ;;  %s2767_s15 = smov %s2365_s16 }
 0x18a   : > { %p14_p9 = scmp.ge.s32.totalorder %s17_s22, 8   ;;  %s2768_s16 = smov %s2369_s17 }
 0x18b   : > { %s2769_s17 = smov %s2488_s7  ;;  %s2770_s18 = smov %s2381_s20 }
 0x18c   : > { %s2771_s19 = smov %s2385_s21  ;;  %s2772_s20 = smov %s2775_s25 }
 0x18d   : > { %s2773_s21 = smov %s2779_s26  ;;  %16 = sbr.rel (!%p14_p9) target bundleno = 5 (0x5), region = 80 }
 0x194   :  { %1668 = vsyncpa [#allocation4], 1 }
 0x195   :  { %1670 = vsyncpa [#allocation4 + $0x1], 1 }

</bundles_post_ra>
